<compile_context>
chip_gen: v6e
topology: v6e:2x2x1
jax: 0.10.0
libtpu: 0.0.40
codegen_flags: <defaults>
</compile_context>

<pallas_src>
import jax
import jax.numpy as jnp
from jax import lax
from jax.experimental import pallas as pl
from jax.experimental.pallas import tpu as pltpu


def _pick_tiling(n, c_in, c_out, hw_pad, itemsize):
    """Choose (batch-per-block, lane-dense spatial tile)."""
    # Largest multiple of 128 that divides hw_pad, capped at 16K lanes
    # (double-buffered block stays a few MiB even on v7x's 64 MiB VMEM).
    cap = 16384
    tile_hw = 128
    t = 128
    limit = min(hw_pad, cap)
    while t <= limit:
        if hw_pad % t == 0:
            tile_hw = t
        t += 128

    # Batch N images per block so each grid step moves ~1 MiB of HBM traffic.
    target_bytes = 1 << 20
    per_image_bytes = (c_in + c_out) * tile_hw * itemsize
    b_n = max(1, min(n, target_bytes // max(per_image_bytes, 1)))
    while n % b_n != 0:
        b_n -= 1

    # v7x shards "parallel" grid axes across its 2 TensorCores: keep >= 2
    # grid steps whenever the problem can be split.
    def n_steps(bn, thw):
        return (n // bn) * (hw_pad // thw)

    while n_steps(b_n, tile_hw) < 2:
        if tile_hw % 256 == 0:          # split the spatial axis (stays 128-mult.)
            tile_hw //= 2
        elif b_n > 1:                   # otherwise split the batched-N block
            b_n_new = b_n - 1
            while n % b_n_new != 0:
                b_n_new -= 1
            b_n = b_n_new
        else:
            break                       # single tiny image: 1 step is all there is

    return b_n, tile_hw


def _pick_chunk(tile_hw):
    """Lane-chunk for in-kernel accumulation (bounds live vreg pressure)."""
    for cand in (2048, 1024, 512, 256, 128):
        if tile_hw % cand == 0:
            return cand
    return tile_hw


def _make_conv1x1_kernel(b_n, c_in, c_out, tile_hw, chunk):
    n_chunks = tile_hw // chunk
    total = b_n * n_chunks

    def kernel(x_ref, wt_ref, b_ref, o_ref):
        # x_ref : [B_N, C_in,  TILE_HW]   channel rows, lane-dense spatial tile
        # wt_ref: [C_out, C_in]           transposed 1x1-conv weight (constant)
        # b_ref : [C_out, 1]              bias column (constant)
        # o_ref : [B_N, C_out, TILE_HW]
        wt = wt_ref[...].astype(jnp.float32)
        bias_col = b_ref[...].astype(jnp.float32)

        def do_chunk(b, j):
            start = pl.multiple_of(j * chunk, chunk)
            x = x_ref[b, :, pl.ds(start, chunk)].astype(jnp.float32)  # [C_in, chunk]
            # Bias as accumulator init; C_in is tiny & static -> unrolled VPU
            # broadcast-FMAs over [C_out, chunk] vregs (no MXU push/pop).
            acc = jnp.broadcast_to(bias_col, (c_out, chunk))
            for ci in range(c_in):
                acc = acc + wt[:, ci:ci + 1] * x[ci:ci + 1, :]
            o_ref[b, :, pl.ds(start, chunk)] = acc.astype(o_ref.dtype)

        if total <= 16:
            # Small static trip count: fully unroll with static indices.
            for b in range(b_n):
                for j in range(n_chunks):
                    do_chunk(b, j)
        else:
            def body(idx, carry):
                do_chunk(idx // n_chunks, idx % n_chunks)
                return carry
            lax.fori_loop(0, total, body, 0, unroll=False)

    return kernel


def conv1x1_nchw_pallas(x_nchw, weight, bias):
    """Conv2d(C_in, C_out, kernel_size=1, bias=True) on an NCHW input.

    weight: [C_in, C_out], bias: [C_out].  Runs directly in NCHW layout
    (channels on sublane, spatial on lane); output written lane-dense.
    """
    n, c_in, h, w = x_nchw.shape
    c_out = weight.shape[1]
    hw = h * w

    # Pad the spatial axis up to a multiple of 128 so stores stay lane-dense
    # and blocks never fall back to an unbounded full-extent tile.
    hw_pad = ((hw + 127) // 128) * 128
    x3 = x_nchw.reshape(n, c_in, hw)            # free row-major view
    if hw_pad != hw:
        x3 = jnp.pad(x3, ((0, 0), (0, 0), (0, hw_pad - hw)))

    wt = weight.T                               # [C_out, C_in]
    b2 = bias.reshape(c_out, 1)                 # [C_out, 1]

    itemsize = jnp.dtype(x_nchw.dtype).itemsize
    b_n, tile_hw = _pick_tiling(n, c_in, c_out, hw_pad, itemsize)
    chunk = _pick_chunk(tile_hw)
    grid = (n // b_n, hw_pad // tile_hw)

    kernel = _make_conv1x1_kernel(b_n, c_in, c_out, tile_hw, chunk)

    flops = 2 * n * hw_pad * c_in * c_out
    bytes_accessed = (itemsize * n * hw_pad * (c_in + c_out)
                      + 4 * (c_in * c_out + c_out))

    y3 = pl.pallas_call(
        kernel,
        out_shape=jax.ShapeDtypeStruct((n, c_out, hw_pad), x_nchw.dtype),
        grid_spec=pltpu.PrefetchScalarGridSpec(
            num_scalar_prefetch=0,
            grid=grid,
            in_specs=[
                # x: batched-N block, lane-dense spatial tile
                pl.BlockSpec((b_n, c_in, tile_hw), lambda ni, ti: (ni, 0, ti)),
                # W^T: constant small block, fetched once
                pl.BlockSpec((c_out, c_in), lambda ni, ti: (0, 0)),
                # bias column: constant small block, fetched once
                pl.BlockSpec((c_out, 1), lambda ni, ti: (0, 0)),
            ],
            out_specs=pl.BlockSpec(
                (b_n, c_out, tile_hw), lambda ni, ti: (ni, 0, ti)
            ),
        ),
        compiler_params=pltpu.CompilerParams(
            dimension_semantics=("parallel", "parallel"),
        ),
        cost_estimate=pl.CostEstimate(
            flops=flops, transcendentals=0, bytes_accessed=bytes_accessed),
    )(x3, wt, b2)

    if hw_pad != hw:
        y3 = y3[:, :, :hw]
    return y3.reshape(n, c_out, h, w)


def inner_module_forward(x_nchw, weight, bias):
    """The wrapped module: Conv2d(C_in, C_out, kernel_size=1) on NCHW input."""
    return conv1x1_nchw_pallas(x_nchw, weight, bias)


def apply_first_elem(input_tuple, weight, bias):
    """Semantics of ApplyFirstElem.forward: (module(x), g_elems)."""
    assert len(input_tuple) == 2
    x, g_elems = input_tuple
    return (inner_module_forward(x, weight, bias), g_elems)


if __name__ == "__main__":
    key = jax.random.PRNGKey(0)
    k_x, k_g, k_w, k_b = jax.random.split(key, 4)

    N, C_IN, H, W = 2, 4, 16, 16
    C_OUT = 8

    x = jax.random.normal(k_x, (N, C_IN, H, W), dtype=jnp.float32)
    g_elems = jax.random.normal(k_g, (N, 3, H, W), dtype=jnp.float32)

    # Deterministic parameter init (Conv2d(4, 8, kernel_size=1) weights),
    # stored as weight [C_in, C_out], bias [C_out].
    weight = jax.random.normal(k_w, (C_IN, C_OUT), dtype=jnp.float32) * 0.1
    bias = jax.random.normal(k_b, (C_OUT,), dtype=jnp.float32) * 0.1

    out_x, out_g = apply_first_elem((x, g_elems), weight, bias)
    jax.block_until_ready(out_x)
    jax.block_until_ready(out_g)

    # Sanity checks vs. a pure-JAX reference of the wrapped module.
    ref = jnp.einsum("nchw,cd->ndhw", x, weight) + bias[None, :, None, None]
    assert out_x.shape == (N, C_OUT, H, W)
    assert out_g.shape == g_elems.shape
    assert jnp.allclose(out_x, ref, atol=1e-5, rtol=1e-5)
    assert jnp.array_equal(out_g, g_elems)

    print("KERNEL_OK")
</pallas_src>

<mosaic_0001>
module attributes {stable_mosaic.version = 11 : i64} {
  func.func @kernel(%arg0: i32, %arg1: i32, %arg2: memref<2x4x128xf32, #tpu.memory_space<vmem>>, %arg3: memref<8x4xf32, #tpu.memory_space<vmem>>, %arg4: memref<8x1xf32, #tpu.memory_space<vmem>>, %arg5: memref<2x8x128xf32, #tpu.memory_space<vmem>>) attributes {dimension_semantics = [#tpu.dimension_semantics<parallel>, #tpu.dimension_semantics<parallel>], iteration_bounds = array<i64: 1, 2>, scalar_prefetch = 0 : i64, scratch_operands = 0 : i64, tpu.core_type = #tpu.core_type<tc>, window_params = [{transform_indices = @transform_0, window_bounds = array<i64: 2, 4, 128>}, {pipeline_mode = #tpu.pipeline_mode<synchronous>, transform_indices = @transform_1, window_bounds = array<i64: 8, 4>}, {pipeline_mode = #tpu.pipeline_mode<synchronous>, transform_indices = @transform_2, window_bounds = array<i64: 8, 1>}, {transform_indices = @transform_3, window_bounds = array<i64: 2, 8, 128>}]} {
    %c0 = arith.constant 0 : index
    %c0_0 = arith.constant 0 : index
    %0 = vector.load %arg3[%c0, %c0_0] : memref<8x4xf32, #tpu.memory_space<vmem>>, vector<8x4xf32>
    %c0_1 = arith.constant 0 : index
    %c0_2 = arith.constant 0 : index
    %1 = vector.load %arg4[%c0_1, %c0_2] : memref<8x1xf32, #tpu.memory_space<vmem>>, vector<8x1xf32>
    %c0_i32 = arith.constant 0 : i32
    %2 = tpu.assume_multiple %c0_i32, 128 : i32
    %c0_3 = arith.constant 0 : index
    %c0_4 = arith.constant 0 : index
    %3 = arith.index_cast %2 : i32 to index
    %4 = vector.load %arg2[%c0_3, %c0_4, %3] : memref<2x4x128xf32, #tpu.memory_space<vmem>>, vector<1x4x128xf32>
    %5 = vector.shape_cast %4 : vector<1x4x128xf32> to vector<4x128xf32>
    %6 = vector.shape_cast %1 : vector<8x1xf32> to vector<8x1xf32>
    %7 = vector.broadcast %6 : vector<8x1xf32> to vector<8x128xf32>
    %8 = vector.extract_strided_slice %0 {offsets = [0, 0], sizes = [8, 1], strides = [1, 1]} : vector<8x4xf32> to vector<8x1xf32>
    %9 = vector.extract_strided_slice %5 {offsets = [0, 0], sizes = [1, 128], strides = [1, 1]} : vector<4x128xf32> to vector<1x128xf32>
    %10 = vector.broadcast %8 : vector<8x1xf32> to vector<8x128xf32>
    %11 = vector.broadcast %9 : vector<1x128xf32> to vector<8x128xf32>
    %12 = arith.mulf %10, %11 : vector<8x128xf32>
    %13 = arith.addf %7, %12 : vector<8x128xf32>
    %14 = vector.extract_strided_slice %0 {offsets = [0, 1], sizes = [8, 1], strides = [1, 1]} : vector<8x4xf32> to vector<8x1xf32>
    %15 = vector.extract_strided_slice %5 {offsets = [1, 0], sizes = [1, 128], strides = [1, 1]} : vector<4x128xf32> to vector<1x128xf32>
    %16 = vector.broadcast %14 : vector<8x1xf32> to vector<8x128xf32>
    %17 = vector.broadcast %15 : vector<1x128xf32> to vector<8x128xf32>
    %18 = arith.mulf %16, %17 : vector<8x128xf32>
    %19 = arith.addf %13, %18 : vector<8x128xf32>
    %20 = vector.extract_strided_slice %0 {offsets = [0, 2], sizes = [8, 1], strides = [1, 1]} : vector<8x4xf32> to vector<8x1xf32>
    %21 = vector.extract_strided_slice %5 {offsets = [2, 0], sizes = [1, 128], strides = [1, 1]} : vector<4x128xf32> to vector<1x128xf32>
    %22 = vector.broadcast %20 : vector<8x1xf32> to vector<8x128xf32>
    %23 = vector.broadcast %21 : vector<1x128xf32> to vector<8x128xf32>
    %24 = arith.mulf %22, %23 : vector<8x128xf32>
    %25 = arith.addf %19, %24 : vector<8x128xf32>
    %26 = vector.extract_strided_slice %0 {offsets = [0, 3], sizes = [8, 1], strides = [1, 1]} : vector<8x4xf32> to vector<8x1xf32>
    %27 = vector.extract_strided_slice %5 {offsets = [3, 0], sizes = [1, 128], strides = [1, 1]} : vector<4x128xf32> to vector<1x128xf32>
    %28 = vector.broadcast %26 : vector<8x1xf32> to vector<8x128xf32>
    %29 = vector.broadcast %27 : vector<1x128xf32> to vector<8x128xf32>
    %30 = arith.mulf %28, %29 : vector<8x128xf32>
    %31 = arith.addf %25, %30 : vector<8x128xf32>
    %c0_5 = arith.constant 0 : index
    %c0_6 = arith.constant 0 : index
    %32 = arith.index_cast %2 : i32 to index
    %33 = vector.load %arg5[%c0_5, %c0_6, %32] : memref<2x8x128xf32, #tpu.memory_space<vmem>>, vector<1x8x128xf32>
    %34 = vector.shape_cast %33 : vector<1x8x128xf32> to vector<8x128xf32>
    %35 = vector.shape_cast %31 : vector<8x128xf32> to vector<1x8x128xf32>
    tpu.vector_store %arg5[%c0_5, %c0_6, %32], %35 {strides = array<i32>} : memref<2x8x128xf32, #tpu.memory_space<vmem>>, vector<1x8x128xf32>,
    %c0_i32_7 = arith.constant 0 : i32
    %36 = tpu.assume_multiple %c0_i32_7, 128 : i32
    %c1 = arith.constant 1 : index
    %c0_8 = arith.constant 0 : index
    %37 = arith.index_cast %36 : i32 to index
    %38 = vector.load %arg2[%c1, %c0_8, %37] : memref<2x4x128xf32, #tpu.memory_space<vmem>>, vector<1x4x128xf32>
    %39 = vector.shape_cast %38 : vector<1x4x128xf32> to vector<4x128xf32>
    %40 = vector.shape_cast %1 : vector<8x1xf32> to vector<8x1xf32>
    %41 = vector.broadcast %40 : vector<8x1xf32> to vector<8x128xf32>
    %42 = vector.extract_strided_slice %0 {offsets = [0, 0], sizes = [8, 1], strides = [1, 1]} : vector<8x4xf32> to vector<8x1xf32>
    %43 = vector.extract_strided_slice %39 {offsets = [0, 0], sizes = [1, 128], strides = [1, 1]} : vector<4x128xf32> to vector<1x128xf32>
    %44 = vector.broadcast %42 : vector<8x1xf32> to vector<8x128xf32>
    %45 = vector.broadcast %43 : vector<1x128xf32> to vector<8x128xf32>
    %46 = arith.mulf %44, %45 : vector<8x128xf32>
    %47 = arith.addf %41, %46 : vector<8x128xf32>
    %48 = vector.extract_strided_slice %0 {offsets = [0, 1], sizes = [8, 1], strides = [1, 1]} : vector<8x4xf32> to vector<8x1xf32>
    %49 = vector.extract_strided_slice %39 {offsets = [1, 0], sizes = [1, 128], strides = [1, 1]} : vector<4x128xf32> to vector<1x128xf32>
    %50 = vector.broadcast %48 : vector<8x1xf32> to vector<8x128xf32>
    %51 = vector.broadcast %49 : vector<1x128xf32> to vector<8x128xf32>
    %52 = arith.mulf %50, %51 : vector<8x128xf32>
    %53 = arith.addf %47, %52 : vector<8x128xf32>
    %54 = vector.extract_strided_slice %0 {offsets = [0, 2], sizes = [8, 1], strides = [1, 1]} : vector<8x4xf32> to vector<8x1xf32>
    %55 = vector.extract_strided_slice %39 {offsets = [2, 0], sizes = [1, 128], strides = [1, 1]} : vector<4x128xf32> to vector<1x128xf32>
    %56 = vector.broadcast %54 : vector<8x1xf32> to vector<8x128xf32>
    %57 = vector.broadcast %55 : vector<1x128xf32> to vector<8x128xf32>
    %58 = arith.mulf %56, %57 : vector<8x128xf32>
    %59 = arith.addf %53, %58 : vector<8x128xf32>
    %60 = vector.extract_strided_slice %0 {offsets = [0, 3], sizes = [8, 1], strides = [1, 1]} : vector<8x4xf32> to vector<8x1xf32>
    %61 = vector.extract_strided_slice %39 {offsets = [3, 0], sizes = [1, 128], strides = [1, 1]} : vector<4x128xf32> to vector<1x128xf32>
    %62 = vector.broadcast %60 : vector<8x1xf32> to vector<8x128xf32>
    %63 = vector.broadcast %61 : vector<1x128xf32> to vector<8x128xf32>
    %64 = arith.mulf %62, %63 : vector<8x128xf32>
    %65 = arith.addf %59, %64 : vector<8x128xf32>
    %c1_9 = arith.constant 1 : index
    %c0_10 = arith.constant 0 : index
    %66 = arith.index_cast %36 : i32 to index
    %67 = vector.load %arg5[%c1_9, %c0_10, %66] : memref<2x8x128xf32, #tpu.memory_space<vmem>>, vector<1x8x128xf32>
    %68 = vector.shape_cast %67 : vector<1x8x128xf32> to vector<8x128xf32>
    %69 = vector.shape_cast %65 : vector<8x128xf32> to vector<1x8x128xf32>
    tpu.vector_store %arg5[%c1_9, %c0_10, %66], %69 {strides = array<i32>} : memref<2x8x128xf32, #tpu.memory_space<vmem>>, vector<1x8x128xf32>,
    return
  }
  func.func @transform_0(%arg0: i32, %arg1: i32) -> (i32, i32, i32) {
    %c0_i32 = arith.constant 0 : i32
    %c0_i32_0 = arith.constant 0 : i32
    return %arg0, %c0_i32, %arg1 : i32, i32, i32
  }
  func.func @transform_1(%arg0: i32, %arg1: i32) -> (i32, i32) {
    %c0_i32 = arith.constant 0 : i32
    %c0_i32_0 = arith.constant 0 : i32
    %c0_i32_1 = arith.constant 0 : i32
    return %c0_i32, %c0_i32_0 : i32, i32
  }
  func.func @transform_2(%arg0: i32, %arg1: i32) -> (i32, i32) {
    %c0_i32 = arith.constant 0 : i32
    %c0_i32_0 = arith.constant 0 : i32
    %c0_i32_1 = arith.constant 0 : i32
    return %c0_i32, %c0_i32_0 : i32, i32
  }
  func.func @transform_3(%arg0: i32, %arg1: i32) -> (i32, i32, i32) {
    %c0_i32 = arith.constant 0 : i32
    %c0_i32_0 = arith.constant 0 : i32
    return %arg0, %c0_i32, %arg1 : i32, i32, i32
  }
}

</mosaic_0001>

<bundles_post_ra>
// kernel: tpu_custom_call.1
= control target key start
LH: loop header
LB: loop body
LE: loop exit
PB: predicated region body
PF: predicated region fallthrough
CT: control target
= control target key end

     0   :  { %8 = vsyncpa [#allocation4], 0  ;;  %s731_s0 = inlined_call_operand.vmem [shape: f32[2,4,256], index: 0, kind: input, shape index: {}]   ;;  %s732_s1 = inlined_call_operand.vmem [shape: f32[8,4], index: 1, kind: input, shape index: {}]   ;;  %s733_s2 = inlined_call_operand.vmem [shape: f32[8,1], index: 2, kind: input, shape index: {}]   ;;  %s734_s3 = inlined_call_operand.hbm [shape: f32[2,8,256], index: 3, kind: output, shape index: {}]  }
   0x1   :  { %10 = vsyncpa [#allocation4 + $0x1], 0  ;;  %s602_s12 = smov 0   ;;  %s604_s13 = smov 0  }
   0x2   :  { %s606_s14 = smov 0   ;;  %s608_s15 = smov 0  }
   0x3   :  { %s610_s16 = smov 0   ;;  %s612_s17 = smov 0  }
   0x4 LB: > { %s415_s18 = sadd.s32 4294967295, %s572_s17   ;;  %s416_s19 = sadd.s32 4294967294, %s572_s17   ;;  %s572_s17 = sphi %s612_s17, %s16_s17   ;;  %s568_s16 = sphi %s610_s16, %s741_s16   ;;  %s564_s15 = sphi %s608_s15, %s740_s15   ;;  %s560_s14 = sphi %s606_s14, %s739_s14   ;;  %s556_s13 = sphi %s604_s13, %s738_s13   ;;  %s552_s12 = sphi %s602_s12, %s737_s12  }
   0x5   : > { %s25_s20 = sadd.s32 1, %s568_s16  ;;  %s37_s21 = sadd.s32 1, %s560_s14 }
   0x6   : > { %p26_p0 = scmp.ge.s32.totalorder %s25_s20, 2  ;;  %p44_p1 = scmp.ne.s32.totalorder %s560_s14, %s556_s13 }
   0x7   : > { %p45_p2 = scmp.eq.s32.totalorder %s572_s17, 0  ;;  %p118_p3 = scmp.eq.s32.totalorder %s415_s18, 1 }
   0x8   : > { %s743_s20 = smov (%p26_p0, %s25_s20), 0  ;;  %p123_p6 = scmp.ne.s32.totalorder %s556_s13, %s552_s12 }
   0x9   : > { %p46_p4 = por %p45_p2, %p44_p1  ;;  %p641_p5 = por %p118_p3, %p44_p1 }
   0xa   : > { %s33_s23 = ssub.s32 %s568_s16, %s743_s20  ;;  %p124_p8 = scmp.eq.s32.totalorder %s416_s19, 1 }
   0xb   : > { %p35_p7 = scmp.eq.s32.totalorder %s33_s23, 0  ;;  %p418_p10 = scmp.ge.s32.totalorder %s572_s17, 2 }
   0xc   : > { %p652_p9 = por %p124_p8, %p123_p6 }
   0xd   : > { %s650_s24 = scalar_select %p35_p7, %s560_s14, %s37_s21  }
   0xe   : > { %146 = sbr.rel (%p418_p10) target bundleno = 24 (0x18), region = 24 }
  0x13   : > { %149 = sbr.rel (!%p46_p4) target bundleno = 24 (0x18), region = 28  ;;  %s151_s26 = sand.u32 (%p46_p4), 1, %s560_s14  }
  0x14   : > { %s420_s27 = sshll.u32 (%p46_p4), %s568_s16, 2  ;;  %s419_s28 = sshll.u32 (%p46_p4), %s151_s26, 3 }
  0x15   : > { %s158_s4 = scalar_lea.vmem (%p46_p4), %s731_s0, %s420_s27  ;;  %s153_s5 = scalar_lea.vmem (%p46_p4), [#allocation2], %s419_s28 }
  0x16   : > { %v175_v0 = vld [vmem:[%s158_s4] sm:$0xf] (%p46_p4)  ;;  %v177_v1 = vld [vmem:[%s158_s4 + $0x8] sm:$0xf] (%p46_p4) }
  0x17   : > { %176 = vst [vmem:[%s153_s5] sm:$0xf] (%p46_p4), %v175_v0  ;;  %178 = vst [vmem:[%s153_s5 + $0x4] sm:$0xf] (%p46_p4), %v177_v1 }
  0x18 PF: > { %p421_p11 = scmp.ge.s32.totalorder %s572_s17, 1  ;;  %p205_p12 = scmp.lt.s32.totalorder %s572_s17, 3 }
  0x1a   : > { %p206_p13 = pnand %p421_p11, %p205_p12 }
  0x1b   : > { %s673_s10 = sand.u32 (!%p206_p13), 1, %s556_s13   ;;  %s427_s26 = sshll.u32 (!%p206_p13), %s564_s15, 7 }
  0x1c   : > { %209 = sbr.rel (%p206_p13) target bundleno = 187 (0xbb), region = 69  ;;  %s422_s11 = sshll.u32 (!%p206_p13), %s673_s10, 3 }
  0x1d   : > { %s214_s18 = scalar_lea.vmem (!%p206_p13), [#allocation2], %s422_s11  ;;  %s423_s19 = sshll.u32 (!%p206_p13), %s673_s10, 4 }
  0x1e   : > { %s234_s21 = scalar_lea.vmem (!%p206_p13), [#allocation3], %s423_s19  ;;  %s683_s29 = scalar_lea.hbm (!%p206_p13), %s734_s3, %s427_s26 }
  0x1f   : > { %s333_s23 = sshll.u32 (!%p206_p13), %s234_s21, 4  ;;  %s318_s15 = scalar_lea.sflag (!%p206_p13), [#allocation4], %s673_s10  ;;  %s678_s23 = int_to_ptr.vmem [resolvable:$true] %s333_s23 }
  0x20   : > { %s496_s30 = scalar_lea.vmem (!%p206_p13), %s678_s23, 256  ;;  %s578_s4 = smov (!%p206_p13), [#allocation3]  }
  0x21   : > { %v237_v2 = vld [vmem:[%s732_s1] sm:$0xff]  ;;  %v574_v3 = vmov 0   ;;  %v575_v4 = vmov 1   ;;  %v576_v6 = vmov 2   ;;  %v577_v7 = vmov 3   ;;  %p497_p0 = scmp.ne.s32.totalorder %s678_s23, %s496_s30  ;;  %s500_s5 = sshll.u32 %s578_s4, 4  ;;  %s501_s5 = int_to_ptr.vmem [resolvable:$false] %s500_s5 }
  0x22   : > { %492 = vset.pattern.permute.xlu0 %v574_v3  ;;  %493 = vset.pattern.permute.xlu1 %v575_v4  ;;  %v238_v5 = vld [vmem:[%s733_s2] sm:$0xff]  ;;  %v250_v8 = vlaneseq  ;;  %s502_s6 = scalar_lea.vmem %s501_s5, 512  ;;  %p503_p3 = scmp.lt.s32.totalorder %s678_s23, %s501_s5 }
  0x23   : > { %247 = vperm.xlu0 %492, %v237_v2   ;;  %257 = vperm.xlu1 %493, %v237_v2   ;;  %v239_v11 = vld [vmem:[%s214_s18] sm:$0xf]  ;;  %v424_v12 = vld [vmem:[%s214_s18 + $0x4] sm:$0xf]  ;;  %p498_p1 = pnand %p497_p0, %p641_p5  ;;  %p504_p4 = scmp.lt.s32.totalorder %s502_s6, %s496_s30 }
  0x24   : > { %v251_v9 = vshrl.u32 %v250_v8, 7 }
  0x25   : > { %p499_p2 = pneg %p498_p1  ;;  %p505_p6 = por %p504_p4, %p503_p3 }
  0x26   : > { %v252_v10 = vsub.s32 0, %v251_v9  ;;  %v262_v13 = vsub.s32 1, %v251_v9  ;;  %v272_v14 = vsub.s32 2, %v251_v9  ;;  %v282_v23 = vsub.s32 3, %v251_v9 }
  0x27   : > { %242 = vperm.xlu0 %492, %v238_v5   ;;  %494 = vset.pattern.permute.xlu1 %v576_v6  ;;  %p506_p7 = pnand %p505_p6, %p499_p2 }
  0x28   : > { %267 = vperm.xlu1 %494, %v237_v2   ;;  %v253_v15 = vrot.slane %v239_v11, %v252_v10  ;;  %v293_v16 = vrot.slane %v424_v12, %v252_v10  ;;  %v263_v19 = vrot.slane %v239_v11, %v262_v13  ;;  %v299_v20 = vrot.slane %v424_v12, %v262_v13 }
  0x29   : > { %v273_v21 = vrot.slane %v239_v11, %v272_v14  ;;  %v305_v22 = vrot.slane %v424_v12, %v272_v14  ;;  %v283_v34 = vrot.slane %v239_v11, %v282_v23  ;;  %v311_v35 = vrot.slane %v424_v12, %v282_v23 }
  0x2b   : > { %495 = vset.pattern.permute.xlu0 %v577_v7 }
  0x2c   : > { %277 = vperm.xlu0 %495, %v237_v2  }
  0x9e   : > { %v248_v17 = vpop.permute.xlu0 %247  ;;  %v258_v18 = vpop.permute.xlu1 %257 }
  0x9f   : > { %v254_v24 = vmul.f32 %v253_v15, %v248_v17  ;;  %v294_v25 = vmul.f32 %v293_v16, %v248_v17  ;;  %v264_v27 = vmul.f32 %v263_v19, %v258_v18  ;;  %v300_v28 = vmul.f32 %v299_v20, %v258_v18 }
  0xa2   : > { %v243_v26 = vpop.permute.xlu0 %242 }
  0xa3   : > { %v255_v29 = vadd.f32 %v254_v24, %v243_v26  ;;  %v295_v30 = vadd.f32 %v294_v25, %v243_v26  ;;  %v268_v31 = vpop.permute.xlu1 %267 }
  0xa4   : > { %v274_v32 = vmul.f32 %v273_v21, %v268_v31  ;;  %v306_v33 = vmul.f32 %v305_v22, %v268_v31 }
  0xa5   : > { %v265_v36 = vadd.f32 %v264_v27, %v255_v29  ;;  %v301_v37 = vadd.f32 %v300_v28, %v295_v30 }
  0xa7   : > { %v275_v38 = vadd.f32 %v274_v32, %v265_v36  ;;  %v307_v39 = vadd.f32 %v306_v33, %v301_v37  ;;  %v278_v40 = vpop.permute.xlu0 %277 }
  0xa8   : > { %v284_v41 = vmul.f32 %v283_v34, %v278_v40  ;;  %v312_v42 = vmul.f32 %v311_v35, %v278_v40 }
  0xaa   : > { %v285_v43 = vadd.f32 %v284_v41, %v275_v38  ;;  %v313_v44 = vadd.f32 %v312_v42, %v307_v39 }
  0xac   : > { %286 = vst [vmem:[%s234_s21] sm:$0xff] %v285_v43  ;;  %425 = vst [vmem:[%s234_s21 + $0x8] sm:$0xff] %v313_v44 }
  0xad   : > { %509 = shalt.err (!%p506_p7)
}
  0xae   : > { %s510_s7 = scalar_lea.hbm %s683_s29, 256  ;;  %s514_s11 = scalar_lea.hbm %s734_s3, 512 }
  0xaf   : > { %p511_p8 = scmp.ne.s32.totalorder %s683_s29, %s510_s7  ;;  %p515_p13 = scmp.lt.s32.totalorder %s683_s29, %s734_s3 }
  0xb0   : > { %p516_p0 = scmp.lt.s32.totalorder %s514_s11, %s510_s7 }
  0xb1   : > { %p512_p11 = pnand %p511_p8, %p641_p5 }
  0xb2   : > { %p517_p1 = por %p516_p0, %p515_p13 }
  0xb3   : > { %p513_p12 = pneg %p512_p11 }
  0xb5   : > { %p518_p2 = pnand %p517_p1, %p513_p12 }
  0xb7   : > { %521 = shalt.err (!%p518_p2)
}
  0xb8   : > { %s579_s21 = smov 128   ;;  %s580_s26 = smov 256  }
  0xb9   : > { %s581_s27 = smov 8  }
  0xba   : > { %430 = dma.vmem_to_hbm [thread:$0]  (%p641_p5), %s678_s23, 256, %s683_s29, %s318_s15, %s579_s21, %s580_s26, %s581_s27  }
  0xbb PF: > { %s348_s28 = sand.u32 1, %s552_s12   ;;  %p433_p3 = pnand %p418_p10, %p652_p9 }
  0xbc   : > { %s349_s30 = scalar_lea.sflag [#allocation4], %s348_s28 }
  0xbd   : > { %p434_p4 = pneg %p433_p3 }
  0xbf   : > { %547 = dma.done.wait (%p434_p4), %s349_s30, 256  }
  0xc0   : > { %549 = vsyncadd (%p434_p4), %s349_s30, 4294967040  ;;  %s16_s17 = sadd.s32 1, %s572_s17   ;;  %s737_s12 = smov %s556_s13 }
  0xc1   : > { %p13_p6 = scmp.ge.s32.totalorder %s16_s17, 4   ;;  %s738_s13 = smov %s560_s14 }
  0xc2   : > { %s739_s14 = smov %s650_s24  ;;  %s740_s15 = smov %s568_s16 }
  0xc3   : > { %s741_s16 = smov %s743_s20  ;;  %15 = sbr.rel (!%p13_p6) target bundleno = 4 (0x4), region = 115 }
  0xc8   :  { %354 = vsyncpa [#allocation4], 1 }
  0xc9   :  { %356 = vsyncpa [#allocation4 + $0x1], 1 }

</bundles_post_ra>
